<compile_context>
chip_gen: v5e
topology: v5e:2x2
jax: 0.10.0
libtpu: 0.0.40
codegen_flags: <defaults>
</compile_context>

<pallas_src>
import functools
import math

import jax
import jax.numpy as jnp
from jax import lax
from jax.experimental import pallas as pl
from jax.experimental.pallas import tpu as pltpu

NORM_EPS = 1e-12  # F.normalize default eps


def _round_up(x, m):
    return ((x + m - 1) // m) * m


def _arc_margin_kernel(feat_ref, wT_ref, label_ref, out_ref, *,
                       s, cos_m, sin_m, th, mm, easy_margin, tile_o):
    f_n = feat_ref[...]          # (TB, D)  bf16, pre-normalized
    w_n = wT_ref[...]            # (D, TO)  bf16, pre-normalized, pre-transposed
    lbl = label_ref[...]         # (TB, 1)  int32

    # cosine = normalize(feature) @ normalize(weight).T  -> MXU bf16, f32 accum
    cosine = jnp.dot(f_n, w_n, preferred_element_type=jnp.float32)   # (TB, TO)

    # Global class ids covered by this column tile; class axis is grid dim 0.
    j = pl.program_id(0)
    col = j * tile_o + lax.broadcasted_iota(jnp.int32, cosine.shape, 1)
    is_tgt = (col == lbl)                                            # (TB, TO) bool

    # Target cosine per row (0 if the label column is not in this tile; the
    # mask row is then all-False so the delta below is masked out anyway).
    tgt = jnp.sum(jnp.where(is_tgt, cosine, 0.0), axis=1, keepdims=True)  # (TB, 1)

    # Margin math on the (TB, 1) target column only.
    sine = jnp.sqrt(jnp.clip(1.0 - tgt * tgt, 0.0, 1.0))
    phi = tgt * cos_m - sine * sin_m
    if easy_margin:
        phi = jnp.where(tgt > 0.0, phi, tgt)
    else:
        phi = jnp.where(tgt > th, phi, tgt - mm)
    delta = phi - tgt                                                # (TB, 1)

    # output = s * (one_hot * phi + (1 - one_hot) * cosine)
    out_ref[...] = (s * (cosine + jnp.where(is_tgt, delta, 0.0))).astype(out_ref.dtype)


def arc_margin_product(feature, weight, label, *, s=30.0, m=0.5, easy_margin=False):
    """feature: (B, D) f32, weight: (O, D) f32, label: (B,) int.

    Returns (B, O) f32, matching ArcMarginProduct.forward(feature, label).
    """
    B, D = feature.shape
    O = weight.shape[0]

    # Pre-normalize once in f32 (F.normalize semantics: x / max(||x||, eps)),
    # then cast to bf16 so the big weight stream is half-width in HBM.
    f32 = feature.astype(jnp.float32)
    w32 = weight.astype(jnp.float32)
    f_n = f32 * lax.rsqrt(jnp.maximum(jnp.sum(f32 * f32, axis=1, keepdims=True),
                                      NORM_EPS * NORM_EPS))
    w_n = w32 * lax.rsqrt(jnp.maximum(jnp.sum(w32 * w32, axis=1, keepdims=True),
                                      NORM_EPS * NORM_EPS))

    # Tile sizes: TB covers the whole (padded) batch up to 256 rows, TO is a
    # lane-dense 1024-wide class tile (bf16 weight tile = 2*D KiB, ~2x that
    # double-buffered) -- comfortably inside scoped VMEM on v5e/v6e/v7x with
    # the explicit vmem_limit below.
    TB = min(256, _round_up(B, 8))
    TO = min(1024, _round_up(O, 128))
    Bp = _round_up(B, TB)
    Op = _round_up(O, TO)

    f_bf = jnp.pad(f_n, ((0, Bp - B), (0, 0))).astype(jnp.bfloat16)           # (Bp, D)
    wT_bf = jnp.pad(w_n, ((0, Op - O), (0, 0))).astype(jnp.bfloat16).T        # (D, Op)
    lbl = jnp.pad(label.astype(jnp.int32).reshape(B, 1), ((0, Bp - B), (0, 0)))

    kernel = functools.partial(
        _arc_margin_kernel,
        s=float(s),
        cos_m=math.cos(m),
        sin_m=math.sin(m),
        th=math.cos(math.pi - m),
        mm=math.sin(math.pi - m) * m,
        easy_margin=bool(easy_margin),
        tile_o=TO,
    )

    # Grid: (class tiles, batch tiles).  Batch is innermost, so the weight
    # block index (which depends only on the class axis) is unchanged across
    # the inner loop and its HBM DMA is skipped -> each weight byte is read
    # exactly once.  Class axis first also steers the v7x megacore split onto
    # the class dimension.
    out = pl.pallas_call(
        kernel,
        out_shape=jax.ShapeDtypeStruct((Bp, Op), jnp.float32),
        grid=(Op // TO, Bp // TB),
        in_specs=[
            pl.BlockSpec((TB, D), lambda j, i: (i, 0)),   # feature row-tile (bf16)
            pl.BlockSpec((D, TO), lambda j, i: (0, j)),   # weight class-tile (bf16, (D, TO))
            pl.BlockSpec((TB, 1), lambda j, i: (i, 0)),   # labels for this row-tile
        ],
        out_specs=pl.BlockSpec((TB, TO), lambda j, i: (i, j)),
        compiler_params=pltpu.CompilerParams(
            dimension_semantics=("parallel", "parallel"),
            vmem_limit_bytes=64 * 1024 * 1024),
    )(f_bf, wT_bf, lbl)

    return out[:B, :O]


def _reference(feature, weight, label, *, s=30.0, m=0.5, easy_margin=False):
    """Pure-JAX f32 replica of the PyTorch forward, for a sanity check."""
    f_n = feature / jnp.maximum(
        jnp.linalg.norm(feature, axis=1, keepdims=True), NORM_EPS)
    w_n = weight / jnp.maximum(
        jnp.linalg.norm(weight, axis=1, keepdims=True), NORM_EPS)
    cosine = f_n @ w_n.T
    sine = jnp.sqrt(jnp.clip(1.0 - cosine ** 2, 0.0, 1.0))
    phi = cosine * math.cos(m) - sine * math.sin(m)
    if easy_margin:
        phi = jnp.where(cosine > 0, phi, cosine)
    else:
        phi = jnp.where(cosine > math.cos(math.pi - m),
                        phi, cosine - math.sin(math.pi - m) * m)
    one_hot = jax.nn.one_hot(label, weight.shape[0], dtype=jnp.float32)
    return s * (one_hot * phi + (1.0 - one_hot) * cosine)


if __name__ == "__main__":
    B = 8
    in_features = 32
    out_features = 16
    s_scale, margin = 30.0, 0.5

    key = jax.random.PRNGKey(0)
    k_feat, k_w, k_lbl = jax.random.split(key, 3)

    feature = jax.random.normal(k_feat, (B, in_features), dtype=jnp.float32)
    label = jax.random.randint(k_lbl, (B,), 0, out_features, dtype=jnp.int32)

    # nn.init.xavier_uniform_ on weight (out_features, in_features)
    bound = math.sqrt(6.0 / (in_features + out_features))
    weight = jax.random.uniform(
        k_w, (out_features, in_features),
        minval=-bound, maxval=bound, dtype=jnp.float32)

    out = arc_margin_product(feature, weight, label,
                             s=s_scale, m=margin, easy_margin=False)
    jax.block_until_ready(out)

    ref = _reference(feature, weight, label,
                     s=s_scale, m=margin, easy_margin=False)
    assert out.shape == (B, out_features) and out.dtype == jnp.float32
    # bf16 MXU inputs -> ~1e-3 error on cosine, a few e-2 after *s; loose tol.
    assert jnp.max(jnp.abs(out - ref)) < 0.3, float(jnp.max(jnp.abs(out - ref)))
    print("KERNEL_OK")
</pallas_src>

<mosaic_0001>
module attributes {stable_mosaic.version = 11 : i64} {
  func.func @_arc_margin_kernel(%arg0: i32, %arg1: i32, %arg2: memref<8x32xbf16, #tpu.memory_space<vmem>>, %arg3: memref<32x128xbf16, #tpu.memory_space<vmem>>, %arg4: memref<8x1xi32, #tpu.memory_space<vmem>>, %arg5: memref<8x128xf32, #tpu.memory_space<vmem>>) attributes {dimension_semantics = [#tpu.dimension_semantics<parallel>, #tpu.dimension_semantics<parallel>], iteration_bounds = array<i64: 1, 1>, scalar_prefetch = 0 : i64, scratch_operands = 0 : i64, tpu.core_type = #tpu.core_type<tc>, window_params = [{transform_indices = @transform_0, window_bounds = array<i64: 8, 32>}, {transform_indices = @transform_1, window_bounds = array<i64: 32, 128>}, {transform_indices = @transform_2, window_bounds = array<i64: 8, 1>}, {transform_indices = @transform_3, window_bounds = array<i64: 8, 128>}]} {
    %c0 = arith.constant 0 : index
    %c0_0 = arith.constant 0 : index
    %0 = vector.load %arg2[%c0, %c0_0] : memref<8x32xbf16, #tpu.memory_space<vmem>>, vector<8x32xbf16>
    %c0_1 = arith.constant 0 : index
    %c0_2 = arith.constant 0 : index
    %1 = vector.load %arg3[%c0_1, %c0_2] : memref<32x128xbf16, #tpu.memory_space<vmem>>, vector<32x128xbf16>
    %c0_3 = arith.constant 0 : index
    %c0_4 = arith.constant 0 : index
    %2 = vector.load %arg4[%c0_3, %c0_4] : memref<8x1xi32, #tpu.memory_space<vmem>>, vector<8x1xi32>
    %cst = arith.constant dense<0.000000e+00> : vector<8x128xf32>
    %3 = tpu.matmul %0, %1, %cst {dimension_numbers = #tpu.dot_dimension_numbers<[1], [0], [0], [1], [0, 0, 1, 1], [], []>} : vector<8x32xbf16>, vector<32x128xbf16>, vector<8x128xf32> -> vector<8x128xf32>
    %c128_i32 = arith.constant 128 : i32
    %4 = arith.muli %arg0, %c128_i32 : i32
    %5 = tpu.iota {dimensions = array<i32: 1>} : vector<8x128xi32>
    %6 = vector.broadcast %4 : i32 to vector<8x128xi32>
    %7 = arith.addi %6, %5 : vector<8x128xi32>
    %8 = vector.broadcast %2 : vector<8x1xi32> to vector<8x128xi32>
    %9 = arith.cmpi eq, %7, %8 : vector<8x128xi32>
    %cst_5 = arith.constant 0.000000e+00 : f32
    %10 = vector.broadcast %cst_5 : f32 to vector<8x128xf32>
    %11 = arith.select %9, %3, %10 : vector<8x128xi1>, vector<8x128xf32>
    %cst_6 = arith.constant dense<0.000000e+00> : vector<8xf32>
    %12 = vector.multi_reduction <add>, %11, %cst_6 [1] : vector<8x128xf32> to vector<8xf32>
    %13 = vector.shape_cast %12 : vector<8xf32> to vector<8x1xf32>
    %14 = arith.mulf %13, %13 : vector<8x1xf32>
    %cst_7 = arith.constant 1.000000e+00 : f32
    %15 = vector.broadcast %cst_7 : f32 to vector<8x1xf32>
    %16 = arith.subf %15, %14 : vector<8x1xf32>
    %cst_8 = arith.constant 0.000000e+00 : f32
    %cst_9 = arith.constant 1.000000e+00 : f32
    %17 = vector.broadcast %cst_8 : f32 to vector<8x1xf32>
    %18 = arith.maximumf %17, %16 : vector<8x1xf32>
    %19 = vector.broadcast %cst_9 : f32 to vector<8x1xf32>
    %20 = arith.minimumf %19, %18 : vector<8x1xf32>
    %21 = math.sqrt %20 : vector<8x1xf32>
    %cst_10 = arith.constant 0.87758255 : f32
    %22 = vector.broadcast %cst_10 : f32 to vector<8x1xf32>
    %23 = arith.mulf %13, %22 : vector<8x1xf32>
    %cst_11 = arith.constant 0.47942555 : f32
    %24 = vector.broadcast %cst_11 : f32 to vector<8x1xf32>
    %25 = arith.mulf %21, %24 : vector<8x1xf32>
    %26 = arith.subf %23, %25 : vector<8x1xf32>
    %cst_12 = arith.constant -0.87758255 : f32
    %27 = vector.broadcast %cst_12 : f32 to vector<8x1xf32>
    %28 = arith.cmpf ogt, %13, %27 : vector<8x1xf32>
    %cst_13 = arith.constant 0.239712775 : f32
    %29 = vector.broadcast %cst_13 : f32 to vector<8x1xf32>
    %30 = arith.subf %13, %29 : vector<8x1xf32>
    %31 = arith.select %28, %26, %30 : vector<8x1xi1>, vector<8x1xf32>
    %32 = arith.subf %31, %13 : vector<8x1xf32>
    %cst_14 = arith.constant 0.000000e+00 : f32
    %33 = vector.shape_cast %32 : vector<8x1xf32> to vector<8x1xf32>
    %34 = vector.broadcast %33 : vector<8x1xf32> to vector<8x128xf32>
    %35 = vector.broadcast %cst_14 : f32 to vector<8x128xf32>
    %36 = arith.select %9, %34, %35 : vector<8x128xi1>, vector<8x128xf32>
    %37 = arith.addf %3, %36 : vector<8x128xf32>
    %cst_15 = arith.constant 3.000000e+01 : f32
    %38 = vector.broadcast %cst_15 : f32 to vector<8x128xf32>
    %39 = arith.mulf %38, %37 : vector<8x128xf32>
    %c0_16 = arith.constant 0 : index
    %c0_17 = arith.constant 0 : index
    %40 = vector.load %arg5[%c0_16, %c0_17] : memref<8x128xf32, #tpu.memory_space<vmem>>, vector<8x128xf32>
    tpu.vector_store %arg5[%c0_16, %c0_17], %39 {strides = array<i32>} : memref<8x128xf32, #tpu.memory_space<vmem>>, vector<8x128xf32>,
    return
  }
  func.func @transform_0(%arg0: i32, %arg1: i32) -> (i32, i32) {
    %c0_i32 = arith.constant 0 : i32
    %c0_i32_0 = arith.constant 0 : i32
    return %arg1, %c0_i32 : i32, i32
  }
  func.func @transform_1(%arg0: i32, %arg1: i32) -> (i32, i32) {
    %c0_i32 = arith.constant 0 : i32
    %c0_i32_0 = arith.constant 0 : i32
    return %c0_i32, %arg0 : i32, i32
  }
  func.func @transform_2(%arg0: i32, %arg1: i32) -> (i32, i32) {
    %c0_i32 = arith.constant 0 : i32
    %c0_i32_0 = arith.constant 0 : i32
    return %arg1, %c0_i32 : i32, i32
  }
  func.func @transform_3(%arg0: i32, %arg1: i32) -> (i32, i32) {
    %c0_i32 = arith.constant 0 : i32
    return %arg1, %arg0 : i32, i32
  }
}

</mosaic_0001>

<bundles_post_ra>
// kernel: tpu_custom_call.1
= control target key start
LH: loop header
LB: loop body
LE: loop exit
PB: predicated region body
PF: predicated region fallthrough
CT: control target
= control target key end

     0   :  { %8 = vsyncpa [#allocation3], 0  ;;  %s234_s0 = inlined_call_operand.vmem [shape: bf16[8,32], index: 0, kind: input, shape index: {}]   ;;  %s235_s1 = inlined_call_operand.hbm [shape: bf16[32,128], index: 1, kind: input, shape index: {}]   ;;  %s236_s2 = inlined_call_operand.vmem [shape: s32[8,1], index: 2, kind: input, shape index: {}]   ;;  %s237_s3 = inlined_call_operand.hbm [shape: f32[8,128], index: 3, kind: output, shape index: {}]  }
   0x1   :  { %9 = vsyncpa [#allocation4], 0  ;;  %s16_s14 = sshll.u32 %s235_s1, 4  ;;  %s195_s15 = smov [#allocation2]   ;;  %s17_s14 = int_to_ptr.hbm [resolvable:$true] %s16_s14 }
   0x2   :  { %s18_s16 = sshll.u32 %s195_s15, 4  ;;  %s196_s17 = smov 64   ;;  %s19_s16 = int_to_ptr.vmem [resolvable:$true] %s18_s16 }
   0x3   :  { %s197_s18 = smov 4  }
   0x4   :  { %24 = dma.hbm_to_vmem [thread:$0]  %s17_s14, 256, %s19_s16, [#allocation3], %s196_s17, %s196_s17, %s197_s18  }
   0x5   :  { %191 = dma.done.wait [#allocation3], 256  }
   0x6   :  { %192 = vsyncadd [#allocation3], 4294967040  ;;  %v198_v0 = vmov 0   ;;  %v134_v1 = vld [vmem:[#allocation2 + $0x8] sm:$0xff]  ;;  %v37_v2 = vld [vmem:[%s236_s2] sm:$0xff]  ;;  %vm50_vm0 = vcmask 261120   ;;  %v68_v5 = vlaneseq }
   0x7   :  { %140 = vset.pattern.permute.xlu0 %v198_v0  ;;  %60 = vmatpush.bf16.msra.mxu0 %v134_v1  ;;  %v133_v3 = vld [vmem:[#allocation2] sm:$0xff]  ;;  %s113_s24 = sshll.u32 %s237_s3, 4  ;;  %s114_s24 = int_to_ptr.hbm [resolvable:$true] %s113_s24 }
   0x8   :  { %73 = vperm.xlu0 %140, %v37_v2   ;;  %v32_v4 = vld [vmem:[%s234_s0] sm:$0xf]  ;;  %v69_v6 = vand.u32 127, %v68_v5  ;;  %s199_s0 = smov [#allocation5]  }
   0x9   :  { %s111_s2 = sshll.u32 %s199_s0, 4  ;;  %s112_s2 = int_to_ptr.vmem [resolvable:$true] %s111_s2 }
   0xb   :  { %61 = vmatpush.bf16.msra.mxu0 %v133_v3 }
   0xe   :  { %131 = vmatmul.msk.bf16.vlgmr.msra.gmra.mxu0 %vm50_vm0, %v32_v4 }
  0x7a   :  { %v74_v7 = vpop.permute.xlu0 %73 }
  0x7b   :  { %vm75_vm1 = vcmp.eq.s32.totalorder %v69_v6, %v74_v7 }
  0x8b   :  { %v63_v8 = vpop.f32.mrf.mxu0 }
  0x8c   :  { %v76_v9 = vsel %vm75_vm1, %v63_v8, 0.0 }
  0x8d   :  { %77 = vadd.xlane.f32.xlu0 %v76_v9 }
  0x93   :  { %v65_v10 = vpop.f32.mrf.mxu0 }
 0x100   :  { %v78_v11 = vpop.xlane.xlu0 %77 }
 0x101   :  { %v79_v12 = vmul.f32 %v78_v11, %v78_v11  ;;  %v95_v26 = vmul.f32 0.87758255, %v78_v11  ;;  %v132_v29 = vadd.f32 -0.23971277, %v78_v11  ;;  %vm98_vm4 = vcmp.gt.f32.partialorder %v78_v11, -0.87758255 }
 0x103   :  { %v80_v13 = vsub.f32 1.0, %v79_v12 }
 0x105   :  { %v81_v14 = vmax.f32 %v80_v13, 0.0 }
 0x107   :  { %v82_v15 = vmin.f32 %v81_v14, 1.0 }
 0x109   :  { %141 = vrsqrt.f32 %v82_v15  ;;  %vm90_vm2 = vcmp.eq.f32.partialorder %v82_v15, inf  ;;  %v93_v23 = vand.u32 2147483648, %v82_v15  ;;  %vm92_vm3 = vcmp.eq.f32.partialorder %v82_v15, 0.0 }
 0x10f   :  { %v142_v16 = vpop.eup %141 }
 0x110   :  { %v84_v17 = vmul.f32 %v142_v16, %v82_v15 }
 0x112   :  { %v85_v18 = vmul.f32 %v142_v16, %v84_v17 }
 0x114   :  { %v86_v19 = vmul.f32 0.5, %v85_v18 }
 0x116   :  { %v87_v20 = vsub.f32 1.5, %v86_v19 }
 0x118   :  { %v88_v21 = vmul.f32 %v142_v16, %v87_v20 }
 0x11a   :  { %v89_v22 = vmul.f32 %v88_v21, %v82_v15 }
 0x11c   :  { %v91_v24 = vsel %vm90_vm2, %v82_v15, %v89_v22 }
 0x11d   :  { %v94_v25 = vsel %vm92_vm3, %v93_v23, %v91_v24 }
 0x11e   :  { %v96_v27 = vmul.f32 0.47942555, %v94_v25 }
 0x120   :  { %v97_v28 = vsub.f32 %v95_v26, %v96_v27 }
 0x122   :  { %v100_v30 = vsel %vm98_vm4, %v97_v28, %v132_v29 }
 0x123   :  { %v101_v31 = vsub.f32 %v100_v30, %v78_v11 }
 0x125   :  { %v102_v32 = vsel %vm75_vm1, %v101_v31, 0.0 }
 0x126   :  { %v103_v33 = vadd.f32 %v102_v32, %v63_v8 }
 0x128   :  { %v104_v34 = vmul.f32 30.0, %v103_v33 }
 0x12a   :  { %105 = vst [vmem:[#allocation5] sm:$0xff] %v104_v34 }
 0x12b   :  { %116 = dma.vmem_to_hbm [thread:$0]  %s112_s2, 128, %s114_s24, [#allocation4]  }
 0x12c   :  { %193 = dma.done.wait [#allocation4], 128  }
 0x12d   :  { %194 = vsyncadd [#allocation4], 4294967168 }
 0x12e   :  { %121 = vsyncpa [#allocation3], 1 }
 0x12f   :  { %122 = vsyncpa [#allocation4], 1 }

</bundles_post_ra>
